<compile_context>
chip_gen: v6e
topology: v6e:2x2x1
jax: 0.10.0
libtpu: 0.0.40
codegen_flags: <defaults>
</compile_context>

<pallas_src>
import functools

import jax
import jax.numpy as jnp
from jax.experimental import pallas as pl
from jax.experimental.pallas import tpu as pltpu


def _round_up(x, m):
    return (x + m - 1) // m * m


def _cdiv(a, b):
    return (a + b - 1) // b


def _vmem_limit_bytes():
    """~75% of physical VMEM: ~48 MiB on v7x (64 MiB/TC), ~96 MiB on v5e/v6e."""
    try:
        cap = int(pltpu.get_tpu_info().vmem_capacity_bytes)
    except Exception:
        cap = 128 * 1024 * 1024
    return min(cap * 3 // 4, 112 * 1024 * 1024)


def _choose_tile_h(H, h_tile):
    if H <= h_tile:
        return H
    for cand in range(h_tile, 0, -128):          # largest 128-multiple divisor
        if cand % 128 == 0 and H % cand == 0:
            return cand
    return H


# --------------------------------------------------------------------------
# Kernel A: gather-then-project (used when N < S).
# --------------------------------------------------------------------------
def _gather_project_kernel(idx_ref, seq_ref, w1_ref, w2_ref, wtab_ref, b_ref,
                           out_ref, *, s_chunk):
    """idx:(1,tn,2) i32 | seq:(1,S,H) f32 | w1,w2:(H,TH) bf16 | wtab:(ne,TH) bf16
       b:(1,TH) f32 | out:(1,tn,TH) f32."""
    sidx = idx_ref[0]                                   # (tn, 2) int32
    starts = sidx[:, 0:1]                               # (tn, 1)
    ends = sidx[:, 1:2]
    tile_n = starts.shape[0]
    S = seq_ref.shape[1]
    num_emb = wtab_ref.shape[0]

    # Stacked start+end one-hot gather, chunked over the sequence length so the
    # (2*tn, cs) one-hot + chunk stay register/VMEM friendly for long S.
    idx = jnp.concatenate([starts, ends], axis=0)       # (2*tn, 1)
    gathered = None
    for s0 in range(0, S, s_chunk):
        cs = min(s_chunk, S - s0)
        chunk = seq_ref[0, s0:s0 + cs, :].astype(jnp.bfloat16)        # (cs, H)
        iota = jax.lax.broadcasted_iota(jnp.int32, (2 * tile_n, cs), 1) + s0
        oh = (iota == idx).astype(jnp.bfloat16)                        # (2*tn, cs)
        part = jnp.dot(oh, chunk, preferred_element_type=jnp.float32)
        gathered = part if gathered is None else gathered + part

    start_tok = gathered[:tile_n].astype(jnp.bfloat16)                 # (tn, H)
    end_tok = gathered[tile_n:].astype(jnp.bfloat16)

    se = (jnp.dot(start_tok, w1_ref[...], preferred_element_type=jnp.float32)
          + jnp.dot(end_tok, w2_ref[...], preferred_element_type=jnp.float32))

    # Width embedding folded through the output layer.
    widths = jnp.clip(ends - starts, 0, num_emb - 1)                   # (tn, 1)
    iota_w = jax.lax.broadcasted_iota(jnp.int32, (tile_n, num_emb), 1)
    oh_w = (iota_w == widths).astype(jnp.bfloat16)
    width_part = jnp.dot(oh_w, wtab_ref[...], preferred_element_type=jnp.float32)

    out_ref[0] = (se + width_part + b_ref[...]).astype(out_ref.dtype)


# --------------------------------------------------------------------------
# Kernel B: fused one-hot selection over a pre-projected operand (N >= S).
# --------------------------------------------------------------------------
def _fused_select_kernel(idx_ref, stacked_ref, b_ref, out_ref, *, seq_len, num_emb):
    """idx:(1,tn,2) i32 | stacked:(1, 2S+ne, TH) bf16 = [seq@w1f; seq@w2f; wtab]
       b:(1,TH) f32 | out:(1,tn,TH) f32."""
    sidx = idx_ref[0]
    starts = sidx[:, 0:1]
    ends = sidx[:, 1:2]
    tile_n = starts.shape[0]
    widths = jnp.clip(ends - starts, 0, num_emb - 1)

    K = 2 * seq_len + num_emb
    iota = jax.lax.broadcasted_iota(jnp.int32, (tile_n, K), 1)
    # Three disjoint column ranges -> exactly three ones per row; one matmul
    # replaces the start gather, end gather and width lookup.
    oh = ((iota == starts)
          | (iota == (seq_len + ends))
          | (iota == (2 * seq_len + widths))).astype(jnp.bfloat16)     # (tn, K)

    out = jnp.dot(oh, stacked_ref[0], preferred_element_type=jnp.float32) + b_ref[...]
    out_ref[0] = out.astype(out_ref.dtype)


# --------------------------------------------------------------------------
# Wrapper
# --------------------------------------------------------------------------
def span_representation(seq, span_starts, span_ends, params, *,
                        span_tile=128, h_tile=512, s_chunk=512):
    """seq: (B,S,H) f32; span_starts/ends: (B,N) int. Returns (B,N,H) f32."""
    B, S, H = seq.shape
    N = span_starts.shape[1]
    num_emb = params["w_emb"].shape[0]

    # ---- fold the three linear layers (no nonlinearity in between) ----
    w1f = (params["w_start"] @ params["w_o1"]).astype(jnp.bfloat16)        # (H,H)
    w2f = (params["w_end"] @ params["w_o2"]).astype(jnp.bfloat16)          # (H,H)
    wtab = (params["w_emb"] @ params["w_o3"]).astype(jnp.bfloat16)         # (ne,H)
    b_fold = (params["b_start"] @ params["w_o1"]
              + params["b_end"] @ params["w_o2"]
              + params["b_out"]).astype(jnp.float32)                       # (1,H)

    # ---- span tiling (sublane aligned); keep >=2 grid steps for v7x 2 TCs ----
    tile_n = span_tile if N >= span_tile else _round_up(N, 8)
    if B * _cdiv(N, tile_n) < 2 and N > 8:
        tile_n = _round_up(_cdiv(N, 2), 8)
    n_pad = _round_up(N, tile_n)
    n_tiles = n_pad // tile_n

    # ---- optional H_out split so big folded weights fit v7x VMEM ----
    tile_h = _choose_tile_h(H, h_tile)
    h_tiles = H // tile_h

    pad = ((0, 0), (0, n_pad - N))
    span_idx = jnp.stack(
        [jnp.pad(span_starts.astype(jnp.int32), pad),
         jnp.pad(span_ends.astype(jnp.int32), pad)], axis=-1)              # (B,n_pad,2)

    grid = (B, n_tiles, h_tiles)
    idx_spec = pl.BlockSpec((1, tile_n, 2), lambda b, t, h: (b, t, 0))
    out_spec = pl.BlockSpec((1, tile_n, tile_h), lambda b, t, h: (b, t, h))
    out_shape = jax.ShapeDtypeStruct((B, n_pad, H), jnp.float32)
    cparams = pltpu.CompilerParams(
        dimension_semantics=("parallel", "parallel", "parallel"),
        vmem_limit_bytes=_vmem_limit_bytes(),
    )

    def _wspec(shape):
        # Constant-index weights: single-buffer (no point reserving 2x VMEM).
        if h_tiles == 1:
            return pl.BlockSpec(shape, lambda b, t, h: (0, 0),
                                pipeline_mode=pl.Buffered(1))
        return pl.BlockSpec(shape, lambda b, t, h: (0, h))

    proj_first = N >= S   # projecting the whole sequence once beats per-span work

    if proj_first:
        # Project once per batch in the wrapper (plain XLA matmuls) and stack
        # with the folded width table -> single selection matmul in the kernel.
        seq_bf = seq.astype(jnp.bfloat16)
        proj1 = jnp.einsum("bsh,hk->bsk", seq_bf, w1f,
                           preferred_element_type=jnp.float32).astype(jnp.bfloat16)
        proj2 = jnp.einsum("bsh,hk->bsk", seq_bf, w2f,
                           preferred_element_type=jnp.float32).astype(jnp.bfloat16)
        wtab_b = jnp.broadcast_to(wtab[None], (B, num_emb, H))
        stacked = jnp.concatenate([proj1, proj2, wtab_b], axis=1)   # (B,2S+ne,H)
        K = 2 * S + num_emb

        out_padded = pl.pallas_call(
            functools.partial(_fused_select_kernel, seq_len=S, num_emb=num_emb),
            grid=grid,
            in_specs=[idx_spec,
                      pl.BlockSpec((1, K, tile_h), lambda b, t, h: (b, 0, h)),
                      _wspec((1, tile_h))],
            out_specs=out_spec,
            out_shape=out_shape,
            compiler_params=cparams,
        )(span_idx, stacked, b_fold)
    else:
        out_padded = pl.pallas_call(
            functools.partial(_gather_project_kernel, s_chunk=s_chunk),
            grid=grid,
            in_specs=[idx_spec,
                      pl.BlockSpec((1, S, H), lambda b, t, h: (b, 0, 0)),  # f32 seq
                      _wspec((H, tile_h)),
                      _wspec((H, tile_h)),
                      _wspec((num_emb, tile_h)),
                      _wspec((1, tile_h))],
            out_specs=out_spec,
            out_shape=out_shape,
            compiler_params=cparams,
        )(span_idx, seq, w1f, w2f, wtab, b_fold)

    return out_padded[:, :N, :]


# --------------------------------------------------------------------------
# Pure-JAX f32 reference mirroring the PyTorch forward (unfolded weights).
# --------------------------------------------------------------------------
def _reference(seq, span_starts, span_ends, params):
    B = seq.shape[0]
    num_emb = params["w_emb"].shape[0]
    batch_idx = jnp.arange(B)[:, None]
    start_tok = seq[batch_idx, span_starts]                 # (B, N, H)
    end_tok = seq[batch_idx, span_ends]                     # (B, N, H)
    start_embed = start_tok @ params["w_start"] + params["b_start"][0]
    end_embed = end_tok @ params["w_end"] + params["b_end"][0]
    widths = jnp.clip(span_ends - span_starts, 0, num_emb - 1)
    width_embed = params["w_emb"][widths]                   # (B, N, Wdim)
    span_embedding = jnp.concatenate([start_embed, end_embed, width_embed], axis=-1)
    w_out = jnp.concatenate([params["w_o1"], params["w_o2"], params["w_o3"]], axis=0)
    return span_embedding @ w_out + params["b_out"][0]


def _init_params(key, hidden_size, max_span_width, width_embedding_dim):
    H, W = hidden_size, width_embedding_dim
    num_emb = max_span_width + 1
    ks = jax.random.split(key, 7)
    scale = 0.05
    return {
        "w_start": scale * jax.random.normal(ks[0], (H, H), jnp.float32),
        "b_start": scale * jax.random.normal(ks[1], (1, H), jnp.float32),
        "w_end":   scale * jax.random.normal(ks[2], (H, H), jnp.float32),
        "b_end":   scale * jax.random.normal(ks[3], (1, H), jnp.float32),
        "w_emb":   scale * jax.random.normal(ks[4], (num_emb, W), jnp.float32),
        # output_layer weight (in = 2H + W, out = H) pre-split into row blocks
        "w_o1":    scale * jax.random.normal(ks[5], (H, H), jnp.float32),
        "w_o2":    scale * jax.random.normal(jax.random.fold_in(ks[5], 1), (H, H), jnp.float32),
        "w_o3":    scale * jax.random.normal(jax.random.fold_in(ks[5], 2), (W, H), jnp.float32),
        "b_out":   scale * jax.random.normal(ks[6], (1, H), jnp.float32),
    }


if __name__ == "__main__":
    B, S, H = 2, 16, 32
    MAX_SPAN_WIDTH, WIDTH_DIM = 30, 30

    key = jax.random.PRNGKey(0)
    k_seq, k_spans, k_params = jax.random.split(key, 3)

    seq = jax.random.normal(k_seq, (B, S, H), jnp.float32)
    params = _init_params(k_params, H, MAX_SPAN_WIDTH, WIDTH_DIM)

    # N=8 exercises the gather-then-project path (N < S);
    # N=64 exercises the fused pre-projected selection path (N >= S).
    for n_spans in (8, 64):
        ks, kw = jax.random.split(jax.random.fold_in(k_spans, n_spans))
        span_starts = jax.random.randint(ks, (B, n_spans), 0, S, jnp.int32)
        span_widths = jax.random.randint(kw, (B, n_spans), 0, 4, jnp.int32)
        span_ends = jnp.minimum(span_starts + span_widths, S - 1).astype(jnp.int32)

        out = span_representation(seq, span_starts, span_ends, params)
        out = jax.block_until_ready(out)

        ref = _reference(seq, span_starts, span_ends, params)
        assert out.shape == (B, n_spans, H)
        # bf16 MXU operands with f32 accumulation -> tolerance loosened vs pure f32.
        assert jnp.allclose(out, ref, atol=2e-2, rtol=2e-2), f"mismatch (N={n_spans})"

    print("KERNEL_OK")
</pallas_src>

<mosaic_0001>
module attributes {stable_mosaic.version = 11 : i64} {
  func.func @_gather_project_kernel(%arg0: i32, %arg1: i32, %arg2: i32, %arg3: memref<1x8x2xi32, #tpu.memory_space<vmem>>, %arg4: memref<1x16x32xf32, #tpu.memory_space<vmem>>, %arg5: memref<32x32xbf16, #tpu.memory_space<vmem>>, %arg6: memref<32x32xbf16, #tpu.memory_space<vmem>>, %arg7: memref<31x32xbf16, #tpu.memory_space<vmem>>, %arg8: memref<1x32xf32, #tpu.memory_space<vmem>>, %arg9: memref<1x8x32xf32, #tpu.memory_space<vmem>>) attributes {dimension_semantics = [#tpu.dimension_semantics<parallel>, #tpu.dimension_semantics<parallel>, #tpu.dimension_semantics<parallel>], iteration_bounds = array<i64: 2, 1, 1>, scalar_prefetch = 0 : i64, scratch_operands = 0 : i64, tpu.core_type = #tpu.core_type<tc>, window_params = [{transform_indices = @transform_0, window_bounds = array<i64: 1, 8, 2>}, {transform_indices = @transform_1, window_bounds = array<i64: 1, 16, 32>}, {pipeline_mode = #tpu.pipeline_mode<synchronous>, transform_indices = @transform_2, window_bounds = array<i64: 32, 32>}, {pipeline_mode = #tpu.pipeline_mode<synchronous>, transform_indices = @transform_3, window_bounds = array<i64: 32, 32>}, {pipeline_mode = #tpu.pipeline_mode<synchronous>, transform_indices = @transform_4, window_bounds = array<i64: 31, 32>}, {pipeline_mode = #tpu.pipeline_mode<synchronous>, transform_indices = @transform_5, window_bounds = array<i64: 1, 32>}, {transform_indices = @transform_6, window_bounds = array<i64: 1, 8, 32>}]} {
    %c0 = arith.constant 0 : index
    %c0_0 = arith.constant 0 : index
    %c0_1 = arith.constant 0 : index
    %0 = vector.load %arg3[%c0, %c0_0, %c0_1] : memref<1x8x2xi32, #tpu.memory_space<vmem>>, vector<1x8x2xi32>
    %1 = vector.shape_cast %0 : vector<1x8x2xi32> to vector<8x2xi32>
    %2 = vector.extract_strided_slice %1 {offsets = [0, 0], sizes = [8, 1], strides = [1, 1]} : vector<8x2xi32> to vector<8x1xi32>
    %3 = vector.extract_strided_slice %1 {offsets = [0, 1], sizes = [8, 1], strides = [1, 1]} : vector<8x2xi32> to vector<8x1xi32>
    %4 = tpu.concatenate %2, %3 in 0 : vector<8x1xi32>, vector<8x1xi32> -> vector<16x1xi32>
    %c0_2 = arith.constant 0 : index
    %c0_3 = arith.constant 0 : index
    %c0_4 = arith.constant 0 : index
    %5 = vector.load %arg4[%c0_2, %c0_3, %c0_4] : memref<1x16x32xf32, #tpu.memory_space<vmem>>, vector<1x16x32xf32>
    %6 = vector.shape_cast %5 : vector<1x16x32xf32> to vector<16x32xf32>
    %7 = arith.truncf %6 : vector<16x32xf32> to vector<16x32xbf16>
    %8 = tpu.iota {dimensions = array<i32: 1>} : vector<16x16xi32>
    %c0_i32 = arith.constant 0 : i32
    %9 = vector.broadcast %c0_i32 : i32 to vector<16x16xi32>
    %10 = arith.addi %8, %9 : vector<16x16xi32>
    %11 = vector.broadcast %4 : vector<16x1xi32> to vector<16x16xi32>
    %12 = arith.cmpi eq, %10, %11 : vector<16x16xi32>
    %13 = arith.extui %12 : vector<16x16xi1> to vector<16x16xi32>
    %14 = arith.sitofp %13 : vector<16x16xi32> to vector<16x16xf32>
    %15 = arith.truncf %14 : vector<16x16xf32> to vector<16x16xbf16>
    %cst = arith.constant dense<0.000000e+00> : vector<16x32xf32>
    %16 = tpu.matmul %15, %7, %cst {dimension_numbers = #tpu.dot_dimension_numbers<[1], [0], [0], [1], [0, 0, 1, 1], [], []>} : vector<16x16xbf16>, vector<16x32xbf16>, vector<16x32xf32> -> vector<16x32xf32>
    %17 = vector.extract_strided_slice %16 {offsets = [0, 0], sizes = [8, 32], strides = [1, 1]} : vector<16x32xf32> to vector<8x32xf32>
    %18 = arith.truncf %17 : vector<8x32xf32> to vector<8x32xbf16>
    %19 = vector.extract_strided_slice %16 {offsets = [8, 0], sizes = [8, 32], strides = [1, 1]} : vector<16x32xf32> to vector<8x32xf32>
    %20 = arith.truncf %19 : vector<8x32xf32> to vector<8x32xbf16>
    %c0_5 = arith.constant 0 : index
    %c0_6 = arith.constant 0 : index
    %21 = vector.load %arg5[%c0_5, %c0_6] : memref<32x32xbf16, #tpu.memory_space<vmem>>, vector<32x32xbf16>
    %cst_7 = arith.constant dense<0.000000e+00> : vector<8x32xf32>
    %22 = tpu.matmul %18, %21, %cst_7 {dimension_numbers = #tpu.dot_dimension_numbers<[1], [0], [0], [1], [0, 0, 1, 1], [], []>} : vector<8x32xbf16>, vector<32x32xbf16>, vector<8x32xf32> -> vector<8x32xf32>
    %c0_8 = arith.constant 0 : index
    %c0_9 = arith.constant 0 : index
    %23 = vector.load %arg6[%c0_8, %c0_9] : memref<32x32xbf16, #tpu.memory_space<vmem>>, vector<32x32xbf16>
    %cst_10 = arith.constant dense<0.000000e+00> : vector<8x32xf32>
    %24 = tpu.matmul %20, %23, %cst_10 {dimension_numbers = #tpu.dot_dimension_numbers<[1], [0], [0], [1], [0, 0, 1, 1], [], []>} : vector<8x32xbf16>, vector<32x32xbf16>, vector<8x32xf32> -> vector<8x32xf32>
    %25 = arith.addf %22, %24 : vector<8x32xf32>
    %26 = arith.subi %3, %2 : vector<8x1xi32>
    %c0_i32_11 = arith.constant 0 : i32
    %c30_i32 = arith.constant 30 : i32
    %27 = vector.broadcast %c0_i32_11 : i32 to vector<8x1xi32>
    %28 = arith.maxsi %27, %26 : vector<8x1xi32>
    %29 = vector.broadcast %c30_i32 : i32 to vector<8x1xi32>
    %30 = arith.minsi %29, %28 : vector<8x1xi32>
    %31 = tpu.iota {dimensions = array<i32: 1>} : vector<8x31xi32>
    %32 = vector.broadcast %30 : vector<8x1xi32> to vector<8x31xi32>
    %33 = arith.cmpi eq, %31, %32 : vector<8x31xi32>
    %34 = arith.extui %33 : vector<8x31xi1> to vector<8x31xi32>
    %35 = arith.sitofp %34 : vector<8x31xi32> to vector<8x31xf32>
    %36 = arith.truncf %35 : vector<8x31xf32> to vector<8x31xbf16>
    %c0_12 = arith.constant 0 : index
    %c0_13 = arith.constant 0 : index
    %37 = vector.load %arg7[%c0_12, %c0_13] : memref<31x32xbf16, #tpu.memory_space<vmem>>, vector<31x32xbf16>
    %cst_14 = arith.constant dense<0.000000e+00> : vector<8x32xf32>
    %38 = tpu.matmul %36, %37, %cst_14 {dimension_numbers = #tpu.dot_dimension_numbers<[1], [0], [0], [1], [0, 0, 1, 1], [], []>} : vector<8x31xbf16>, vector<31x32xbf16>, vector<8x32xf32> -> vector<8x32xf32>
    %39 = arith.addf %25, %38 : vector<8x32xf32>
    %c0_15 = arith.constant 0 : index
    %c0_16 = arith.constant 0 : index
    %40 = vector.load %arg8[%c0_15, %c0_16] : memref<1x32xf32, #tpu.memory_space<vmem>>, vector<1x32xf32>
    %41 = vector.broadcast %40 : vector<1x32xf32> to vector<8x32xf32>
    %42 = arith.addf %39, %41 : vector<8x32xf32>
    %c0_17 = arith.constant 0 : index
    %c0_18 = arith.constant 0 : index
    %c0_19 = arith.constant 0 : index
    %43 = vector.load %arg9[%c0_17, %c0_18, %c0_19] : memref<1x8x32xf32, #tpu.memory_space<vmem>>, vector<1x8x32xf32>
    %44 = vector.shape_cast %43 : vector<1x8x32xf32> to vector<8x32xf32>
    %45 = vector.shape_cast %42 : vector<8x32xf32> to vector<1x8x32xf32>
    tpu.vector_store %arg9[%c0_17, %c0_18, %c0_19], %45 {strides = array<i32>} : memref<1x8x32xf32, #tpu.memory_space<vmem>>, vector<1x8x32xf32>,
    return
  }
  func.func @transform_0(%arg0: i32, %arg1: i32, %arg2: i32) -> (i32, i32, i32) {
    %c0_i32 = arith.constant 0 : i32
    %c0_i32_0 = arith.constant 0 : i32
    return %arg0, %arg1, %c0_i32 : i32, i32, i32
  }
  func.func @transform_1(%arg0: i32, %arg1: i32, %arg2: i32) -> (i32, i32, i32) {
    %c0_i32 = arith.constant 0 : i32
    %c0_i32_0 = arith.constant 0 : i32
    %c0_i32_1 = arith.constant 0 : i32
    return %arg0, %c0_i32, %c0_i32_0 : i32, i32, i32
  }
  func.func @transform_2(%arg0: i32, %arg1: i32, %arg2: i32) -> (i32, i32) {
    %c0_i32 = arith.constant 0 : i32
    %c0_i32_0 = arith.constant 0 : i32
    %c0_i32_1 = arith.constant 0 : i32
    return %c0_i32, %c0_i32_0 : i32, i32
  }
  func.func @transform_3(%arg0: i32, %arg1: i32, %arg2: i32) -> (i32, i32) {
    %c0_i32 = arith.constant 0 : i32
    %c0_i32_0 = arith.constant 0 : i32
    %c0_i32_1 = arith.constant 0 : i32
    return %c0_i32, %c0_i32_0 : i32, i32
  }
  func.func @transform_4(%arg0: i32, %arg1: i32, %arg2: i32) -> (i32, i32) {
    %c0_i32 = arith.constant 0 : i32
    %c0_i32_0 = arith.constant 0 : i32
    %c0_i32_1 = arith.constant 0 : i32
    return %c0_i32, %c0_i32_0 : i32, i32
  }
  func.func @transform_5(%arg0: i32, %arg1: i32, %arg2: i32) -> (i32, i32) {
    %c0_i32 = arith.constant 0 : i32
    %c0_i32_0 = arith.constant 0 : i32
    %c0_i32_1 = arith.constant 0 : i32
    return %c0_i32, %c0_i32_0 : i32, i32
  }
  func.func @transform_6(%arg0: i32, %arg1: i32, %arg2: i32) -> (i32, i32, i32) {
    %c0_i32 = arith.constant 0 : i32
    return %arg0, %arg1, %arg2 : i32, i32, i32
  }
}

</mosaic_0001>

<bundles_post_ra>
// kernel: tpu_custom_call.1
= control target key start
LH: loop header
LB: loop body
LE: loop exit
PB: predicated region body
PF: predicated region fallthrough
CT: control target
= control target key end

     0   :  { %s1378_s0 = inlined_call_operand.vmem [shape: s32[2,8,2], index: 0, kind: input, shape index: {}]   ;;  %s1379_s1 = inlined_call_operand.hbm [shape: f32[2,16,32], index: 1, kind: input, shape index: {}]   ;;  %s1380_s2 = inlined_call_operand.vmem [shape: bf16[32,32], index: 2, kind: input, shape index: {}]   ;;  %s1381_s3 = inlined_call_operand.hbm [shape: bf16[32,32], index: 3, kind: input, shape index: {}]   ;;  %s1382_s4 = inlined_call_operand.hbm [shape: bf16[31,32], index: 4, kind: input, shape index: {}]   ;;  %s1383_s5 = inlined_call_operand.vmem [shape: f32[1,32], index: 5, kind: input, shape index: {}]   ;;  %s1384_s6 = inlined_call_operand.hbm [shape: f32[2,8,32], index: 6, kind: output, shape index: {}]  }
   0x1   :  { %1388 = sst [smem:[#allocation12_spill]] %s1381_s3 }
   0x2   :  { %1389 = sst [smem:[#allocation13_spill]] %s1382_s4 }
   0x3   :  { %11 = vsyncpa [#allocation3], 0 }
   0x4   :  { %13 = vsyncpa [#allocation3 + $0x1], 0 }
   0x5   :  { %14 = vsyncpa [#allocation6], 0 }
   0x6   :  { %15 = vsyncpa [#allocation4], 0 }
   0x7   :  { %17 = vsyncpa [#allocation4 + $0x1], 0  ;;  %s1156_s21 = smov 0   ;;  %s1158_s22 = smov 0  }
   0x8   :  { %s1160_s23 = smov 0   ;;  %s1162_s24 = smov 0  }
   0x9   :  { %s1164_s25 = smov 0   ;;  %s1166_s26 = smov 0  }
   0xa LB: > { %s761_s27 = sadd.s32 4294967295, %s1104_s26   ;;  %s762_s28 = sadd.s32 4294967294, %s1104_s26   ;;  %s1104_s26 = sphi %s1166_s26, %s23_s26   ;;  %s1100_s25 = sphi %s1164_s25, %s1408_s25   ;;  %s1096_s24 = sphi %s1162_s24, %s1407_s24   ;;  %s1092_s23 = sphi %s1160_s23, %s1406_s23   ;;  %s1088_s22 = sphi %s1158_s22, %s1405_s22   ;;  %s1084_s21 = sphi %s1156_s21, %s1404_s21  }
   0xb   : > { %p90_p0 = scmp.ne.s32.totalorder %s1088_s22, %s1084_s21  ;;  %p1190_p1 = scmp.eq.s32.totalorder %s761_s27, 0 }
   0xc   : > { %p1194_p2 = scmp.eq.s32.totalorder %s761_s27, 1  ;;  %p208_p3 = scmp.eq.s32.totalorder %s762_s28, 1 }
   0xd   : > { %s1390_s29 = scalar_select %p1190_p1, 1, 0 }
   0xe   : > { %p1200_p4 = por %p1190_p1, %p90_p0  ;;  %p763_p5 = scmp.ge.s32.totalorder %s1104_s26, 1 }
   0xf   : > { %p1205_p6 = por %p208_p3, %p90_p0  ;;  %p215_p7 = scmp.lt.s32.totalorder %s1104_s26, 3 }
  0x10   : > { %s1392_s7 = scalar_select %p1200_p4, 1, 0 }
  0x11   : > { %s1393_s8 = scalar_select %p1205_p6, 1, 0 }
  0x12   : > { %p1210_p8 = pnand %p763_p5, %p215_p7  ;;  %s1106_s10 = smov [#allocation5]  }
  0x13   : > { %s230_s11 = sshll.u32 %s1106_s10, 4  ;;  %s1107_s13 = smov [#allocation7]   ;;  %s231_s11 = int_to_ptr.vmem [resolvable:$true] %s230_s11 }
  0x14   : > { %p848_p9 = pneg %p1210_p8  ;;  %s243_s14 = sshll.u32 %s1107_s13, 4  ;;  %s244_s14 = int_to_ptr.vmem [resolvable:$true] %s243_s14 }
  0x15   : > { %s951_s15 = scalar_lea.vmem %s231_s11, 256  ;;  %p959_p5 = scmp.lt.s32.totalorder %s231_s11, %s231_s11 }
  0x16   : > { %p1219_p11 = pnand %p848_p9, %p1190_p1  ;;  %p952_p13 = scmp.ne.s32.totalorder %s231_s11, %s951_s15 }
  0x17   : > { %p960_p7 = scmp.lt.s32.totalorder %s951_s15, %s951_s15 }
  0x18   : > { %p942_p12 = pneg %p1219_p11 }
  0x19   : > { %p961_p10 = por %p960_p7, %p959_p5 }
  0x1a   : > { %p954_p0 = pnand %p952_p13, %p942_p12 }
  0x1c   : > { %p955_p3 = pneg %p954_p0 }
  0x1e   : > { %p962_p9 = pnand %p961_p10, %p955_p3 }
  0x20   : > { %965 = shalt.err (!%p962_p9)
}
  0x21   : > { %s1108_s16 = smov 64   ;;  %s1109_s17 = smov 4  }
  0x22   : > { %s1396_s3 = sld [smem:[#allocation12_spill]]  ;;  %s977_s20 = scalar_lea.vmem %s244_s14, 256 }
  0x23   : > { %p978_p6 = scmp.ne.s32.totalorder %s244_s14, %s977_s20  ;;  %p985_p1 = scmp.lt.s32.totalorder %s244_s14, %s244_s14 }
  0x24   : > { %p986_p4 = scmp.lt.s32.totalorder %s977_s20, %s977_s20 }
  0x25   : > { %p980_p13 = pnand %p978_p6, %p942_p12 }
  0x26   : > { %p987_p5 = por %p986_p4, %p985_p1 }
  0x27   : > { %p981_p0 = pneg %p980_p13 }
  0x28   : > { %851 = dma.hbm_to_vmem [thread:$0]  (!%p1219_p11), %s1396_s3, 256, %s231_s11, [#allocation6], %s1108_s16, %s1108_s16, %s1109_s17  }
  0x29   : > { %p988_p10 = pnand %p987_p5, %p981_p0 }
  0x2b   : > { %991 = shalt.err (!%p988_p10)
}
  0x2c   : > { %s1397_s4 = sld [smem:[#allocation13_spill]]  ;;  %s42_s10 = sadd.s32 1, %s1100_s25 }
  0x2d   : > { %s77_s11 = sadd.s32 1, %s1092_s23  ;;  %p44_p1 = scmp.ge.s32.totalorder %s42_s10, 2 }
  0x2e   : > { %p84_p4 = scmp.ne.s32.totalorder %s1092_s23, %s1088_s22  ;;  %p85_p6 = scmp.eq.s32.totalorder %s1104_s26, 0 }
  0x2f   : > { %p865_p12 = scmp.lt.s32.totalorder %s1104_s26, 2  ;;  %s1410_s10 = smov (%p44_p1, %s42_s10), 0 }
  0x30   : > { %p86_p3 = por %p85_p6, %p84_p4  ;;  %p1251_p7 = por %p1194_p2, %p84_p4 }
  0x31   : > { %s74_s13 = ssub.s32 %s1100_s25, %s1410_s10  ;;  %s270_s15 = sand.u32 1, %s1092_s23  }
  0x32   : > { %854 = dma.hbm_to_vmem [thread:$0]  (!%p1219_p11), %s1397_s4, 256, %s244_s14, [#allocation6], %s1108_s16, %s1108_s16, %s1109_s17  }
  0x33   : > { %p75_p9 = scmp.eq.s32.totalorder %s74_s13, 0  ;;  %s767_s14 = sshll.u32 %s270_s15, 4 }
  0x34   : > { %s794_s16 = sshll.u32 %s1100_s25, 8  ;;  %s274_s27 = scalar_lea.vmem [#allocation2], %s767_s14 }
  0x35   : > { %s1260_s17 = scalar_select %p75_p9, %s1092_s23, %s77_s11  }
  0x36   : > { %s280_s20 = scalar_lea.hbm %s1379_s1, %s794_s16  ;;  %s281_s28 = sshll.u32 %s274_s27, 4  ;;  %s282_s28 = int_to_ptr.vmem [resolvable:$true] %s281_s28 }
  0x37   : > { %p1267_p11 = pnand %p865_p12, %p86_p3  ;;  %s271_s3 = scalar_lea.sflag [#allocation3], %s270_s15 }
  0x38   : > { %s1005_s13 = scalar_lea.vmem %s282_s28, 256  ;;  %s1110_s11 = smov [#allocation2]  }
  0x39   : > { %p994_p2 = pneg %p1267_p11  ;;  %p1006_p13 = scmp.ne.s32.totalorder %s282_s28, %s1005_s13 }
  0x3a   : > { %s1010_s4 = sshll.u32 %s1110_s11, 4  ;;  %s1011_s4 = int_to_ptr.vmem [resolvable:$false] %s1010_s4 }
  0x3b   : > { %p1008_p0 = pnand %p1006_p13, %p994_p2  ;;  %s1012_s16 = scalar_lea.vmem %s1011_s4, 512 }
  0x3c   : > { %p1013_p10 = scmp.lt.s32.totalorder %s282_s28, %s1011_s4  ;;  %p1014_p1 = scmp.lt.s32.totalorder %s1012_s16, %s1005_s13 }
  0x3d   : > { %p1009_p5 = pneg %p1008_p0 }
  0x3e   : > { %p1015_p4 = por %p1014_p1, %p1013_p10 }
  0x40   : > { %p1016_p6 = pnand %p1015_p4, %p1009_p5 }
  0x42   : > { %1019 = shalt.err (!%p1016_p6)
}
  0x43   : > { %s1111_s14 = smov 128   ;;  %s1112_s18 = smov 8  }
  0x44   : > { %858 = dma.hbm_to_vmem [thread:$0]  (!%p1267_p11), %s280_s20, 256, %s282_s28, %s271_s3, %s1111_s14, %s1111_s14, %s1112_s18  }
  0x45   : > { %293 = sbr.rel (%p1210_p8) target bundleno = 746 (0x2ea), region = 44  ;;  %s1278_s15 = sand.u32 (!%p1210_p8), 1, %s1088_s22  }
  0x46   : > { %s771_s19 = sshll.u32 (!%p1210_p8), %s1278_s15, 4  ;;  %s296_s4 = scalar_lea.sflag (!%p1210_p8), [#allocation3], %s1278_s15 }
  0x47   : > { %s299_s27 = scalar_lea.vmem (!%p1210_p8), [#allocation2], %s771_s19  ;;  %p1400_p12 = scmp.ne.s32.totalorder (!%p1210_p8), %s1392_s7, 0 }
  0x4a   : > { %1071 = dma.done.wait (%p1400_p12), %s296_s4, 256  }
  0x4b   : > { %1073 = vsyncadd (%p1400_p12), %s296_s4, 4294967040  ;;  %p1401_p3 = scmp.ne.s32.totalorder %s1390_s29, 0 }
  0x4d   : > { %1075 = dma.done.wait (%p1401_p3), [#allocation6], 512  }
  0x4e   : > { %1077 = vsyncadd (%p1401_p3), [#allocation6], 4294966784  ;;  %p343_p8 = scmp.lt.s32.totalorder %s1096_s24, 1  ;;  %v1113_v0 = vmov 0   ;;  %v1114_v1 = vmov 0.0   ;;  %s1115_s29 = smov 127   ;;  %v357_v9 = vlaneseq }
  0x4f   : > { %931 = vset.pattern.permute.xlu1 %v1113_v0  ;;  %930 = vset.pattern.permute.xlu0 %v1113_v0  ;;  %v354_v3 = vld [vmem:[%s299_s27] sm:$0xff]  ;;  %v355_v4 = vld [vmem:[%s299_s27 + $0x8] sm:$0xff]  ;;  %vm1116_vm0 = vmmov 0   ;;  %s1117_s30 = smov 1   ;;  %v1118_v7 = vmov 1   ;;  %vm372_vm3 = vcmask 130048  }
  0x50   : > { %s344_s3 = scalar_select %p343_p8, %s1096_s24, 1  ;;  %806 = vmatprep.subr.bf16.mxu0 %v1114_v1  ;;  %812 = vmatprep.subr.bf16.mxu1 %v1114_v1  ;;  %v356_v5 = vpack.c.bf16 %v355_v4, %v354_v3  ;;  %v935_v8 = vld [vmem:[#allocation5 + $0x8] sm:$0xff]   ;;  %v358_v10 = vand.u32 127, %v357_v9  ;;  %v936_v21 = vld [vmem:[%s1380_s2] sm:$0xff]   ;;  %vm571_vm6 = vcmask 1046528   ;;  %vm572_vm7 = vcmask 1047552  }
  0x51   : > { %808 = vmatprep.mubr.msk.bf16.mxu0 %vm1116_vm0, %v1114_v1  ;;  %816 = vmatprep.mubr.msk.bf16.mxu1 %vm1116_vm0, %v1114_v1  ;;  %v934_v15 = vld [vmem:[%s1380_s2 + $0x8] sm:$0xff]   ;;  %v937_v22 = vld [vmem:[#allocation5] sm:$0xff]   ;;  %v1119_v23 = vmov 65535   ;;  %vm439_vm8 = vcmask 261120   ;;  %v938_v26 = vld [vmem:[#allocation7 + $0x8] sm:$0xff]   ;;  %vm567_vm10 = vcmask 252928  }
  0x52   : > { %s775_s7 = sshll.u32 %s344_s3, 3  ;;  %807 = vmatpush3.bf16.msra.mxu0 %v356_v5  ;;  %813 = vmatpush3.bf16.msra.mxu1 %v935_v8  ;;  %v573_v24 = vsel %vm571_vm6, 4294967295, %v1119_v23  ;;  %v939_v35 = vld [vmem:[#allocation7] sm:$0xff]   ;;  %s774_s18 = sshll.u32 %s1278_s15, 3  ;;  %v789_v48 = vld [vmem:[%s1383_s5] ss:$0 sm:$0xff] }
  0x53   : > { %s349_s28 = scalar_lea.vmem %s1378_s0, %s775_s7  ;;  %820 = vmatprep.subr.bf16.mxu0 %v1114_v1  ;;  %814 = vmatprep.subr.bf16.mxu1 %v1114_v1  ;;  %v574_v28 = vsel %vm572_vm7, %v573_v24, 0  ;;  %s791_s27 = sshll.u32 %s1096_s24, 7 }
  0x54   : > { %v351_v2 = vld [vmem:[%s349_s28] sm:$0xff]  ;;  %v576_v31 = vand.u32 %v938_v26, %v574_v28  ;;  %s342_s3 = scalar_lea.vmem [#allocation8], %s774_s18  ;;  %s1329_s28 = scalar_lea.hbm %s1384_s6, %s791_s27 }
  0x55   : > { %352 = vrot.lane.b32.xlu0 %v351_v2, %s1115_s29  ;;  %s644_s7 = sshll.u32 %s342_s3, 4  ;;  %s629_s24 = scalar_lea.sflag [#allocation4], %s1278_s15  ;;  %s1331_s7 = int_to_ptr.vmem [resolvable:$true] %s644_s7 }
  0x56   : > { %815 = vmatpush3.bf16.msra.mxu1 %v937_v22  ;;  %s1020_s29 = scalar_lea.vmem %s1331_s7, 128 }
  0x57   : > { %828 = vmatprep.subr.bf16.mxu1 %v1114_v1  ;;  %p1021_p9 = scmp.ne.s32.totalorder %s1331_s7, %s1020_s29 }
  0x59   : > { %360 = vperm.xlu0 %930, %v351_v2   ;;  %p1022_p11 = pnand %p1021_p9, %p1251_p7 }
  0x5b   : > { %p1023_p2 = pneg %p1022_p11 }
  0x5d   : > { %933 = vset.pattern.permute.xlu0 %v1118_v7 }
  0xc7   : > { %v353_v6 = vpop.permute.xlu0 %352 }
  0xc8   : > { %363 = vperm.xlu1 %931, %v353_v6  }
  0xcc   : > { %538 = vrot.lane.b32.xlu1 %v351_v2, %s1117_s30  ;;  %s1120_s30 = smov [#allocation8]  }
  0xcd   : > { %932 = vset.pattern.permute.xlu1 %v1118_v7  ;;  %s1024_s13 = sshll.u32 %s1120_s30, 4  ;;  %s1025_s13 = int_to_ptr.vmem [resolvable:$false] %s1024_s13 }
  0xce   : > { %s1026_s11 = scalar_lea.vmem %s1025_s13, 256  ;;  %p1027_p13 = scmp.lt.s32.totalorder %s1331_s7, %s1025_s13 }
  0xcf   : > { %p1028_p0 = scmp.lt.s32.totalorder %s1026_s11, %s1020_s29 }
  0xd1   : > { %p1029_p5 = por %p1028_p0, %p1027_p13 }
  0xd3   : > { %p1030_p10 = pnand %p1029_p5, %p1023_p2 }
  0xd4   : > { %v361_v11 = vpop.permute.xlu0 %360 }
  0xd5   : > { %vm365_vm1 = vcmp.eq.s32.totalorder %v358_v10, %v361_v11 }
  0xd6   : > { %v776_v13 = vsel %vm365_vm1, 1.0, %v1114_v1 }
 0x143   : > { %v364_v12 = vpop.permute.xlu1 %363 }
 0x144   : > { %vm366_vm2 = vcmp.eq.s32.totalorder %v358_v10, %v364_v12 }
 0x145   : > { %v777_v14 = vsel %vm366_vm2, 1.0, %v1114_v1 }
 0x146   : > { %v371_v16 = vpack.c.bf16 %v777_v14, %v776_v13 }
 0x147   : > { %v539_v17 = vpop.permute.xlu1 %538 }
 0x148   : > { %809 = vmatmul.mubr.msk.bf16.vlgmr.msra.gmra.mxu0 %vm372_vm3, %v371_v16  ;;  %v540_v18 = vsub.s32 %v351_v2, %v539_v17 }
 0x149   : > { %821 = vmatpush3.bf16.msra.mxu0 %v934_v15  ;;  %824 = vmatprep.mubr.msk.bf16.mxu0 %vm1116_vm0, %v1114_v1 }
 0x14a   : > { %vm541_vm4 = vcmp.gt.s32.totalorder %v540_v18, 0  ;;  %822 = vmatprep.subr.bf16.mxu0 %v1114_v1 }
 0x14b   : > { %v542_v19 = vsel %vm541_vm4, %v540_v18, 0 }
 0x14c   : > { %vm543_vm5 = vcmp.lt.s32.totalorder %v542_v19, 30 }
 0x14d   : > { %v544_v20 = vsel %vm543_vm5, %v542_v19, 30  ;;  %823 = vmatpush3.bf16.msra.mxu0 %v936_v21 }
 0x14e   : > { %546 = vperm.xlu1 %932, %v544_v20  }
 0x1c9   : > { %v547_v32 = vpop.permute.xlu1 %546 }
 0x1ca   : > { %vm548_vm9 = vcmp.eq.s32.totalorder %v358_v10, %v547_v32 }
 0x1cb   : > { %v785_v36 = vsel %vm548_vm9, 1.0, %v1114_v1 }
 0x1cc   : > { %v551_v37 = vpack.c.bf16 %v785_v36, %v785_v36 }
 0x208   : > { %v410_v25 = vpop.f32.mrf.mxu0 }
 0x209   : > { %v417_v27 = vpack.c.bf16 %v410_v25, %v410_v25 }
 0x20a   : > { %v810_v29 = vpop.f32.mrf.mxu0 }
 0x20b   : > { %825 = vmatmul.mubr.msk.bf16.vlgmr.msra.gmra.mxu0 %vm439_vm8, %v417_v27 }
 0x20c   : > { %v413_v30 = vpop.f32.mrf.mxu0 }
 0x20d   : > { %v418_v33 = vpack.c.bf16 %v413_v30, %v413_v30 }
 0x20e   : > { %v811_v34 = vpop.f32.mrf.mxu0 }
 0x20f   : > { %817 = vmatmul.mubr.msk.bf16.vlgmr.msra.gmra.mxu1 %vm439_vm8, %v418_v33 }
 0x210   : > { %829 = vmatpush3.bf16.msra.mxu1 %v576_v31  ;;  %832 = vmatprep.mubr.msk.bf16.mxu1 %vm1116_vm0, %v1114_v1 }
 0x211   : > { %830 = vmatprep.subr.bf16.mxu1 %v1114_v1 }
 0x214   : > { %831 = vmatpush3.bf16.msra.mxu1 %v939_v35 }
 0x217   : > { %833 = vmatmul.mubr.msk.bf16.vlgmr.msra.gmra.mxu1 %vm567_vm10, %v551_v37 }
 0x2cb   : > { %v532_v38 = vpop.f32.mrf.mxu0 }
 0x2cd   : > { %v826_v39 = vpop.f32.mrf.mxu0 }
 0x2cf   : > { %v477_v40 = vpop.f32.mrf.mxu1  ;;  %v535_v41 = vpop.f32.mrf.mxu0 }
 0x2d0   : > { %v533_v46 = vadd.f32 %v532_v38, %v477_v40 }
 0x2d1   : > { %v818_v42 = vpop.f32.mrf.mxu1  ;;  %v827_v43 = vpop.f32.mrf.mxu0 }
 0x2d3   : > { %v480_v44 = vpop.f32.mrf.mxu1 }
 0x2d5   : > { %v819_v45 = vpop.f32.mrf.mxu1 }
 0x2d7   : > { %v612_v47 = vpop.f32.mrf.mxu1 }
 0x2d8   : > { %v618_v49 = vadd.f32 %v612_v47, %v533_v46 }
 0x2d9   : > { %v834_v50 = vpop.f32.mrf.mxu1 }
 0x2da   : > { %v626_v51 = vadd.f32 %v789_v48, %v618_v49 }
 0x2db   : > { %v615_v52 = vpop.f32.mrf.mxu1 }
 0x2dc   : > { %627 = vst.msk [vmem:[%s342_s3] sm:$0xff] %vm439_vm8, %v626_v51 }
 0x2dd   : > { %v835_v53 = vpop.f32.mrf.mxu1 }
 0x2de   : > { %1033 = shalt.err (!%p1030_p10)
}
 0x2df   : > { %s1034_s16 = scalar_lea.hbm %s1329_s28, 128  ;;  %s1038_s18 = scalar_lea.hbm %s1384_s6, 256 }
 0x2e0   : > { %p1035_p1 = scmp.ne.s32.totalorder %s1329_s28, %s1034_s16  ;;  %p1039_p12 = scmp.lt.s32.totalorder %s1329_s28, %s1384_s6 }
 0x2e1   : > { %p1040_p3 = scmp.lt.s32.totalorder %s1038_s18, %s1034_s16 }
 0x2e2   : > { %p1036_p4 = pnand %p1035_p1, %p1251_p7 }
 0x2e3   : > { %p1041_p8 = por %p1040_p3, %p1039_p12 }
 0x2e4   : > { %p1037_p6 = pneg %p1036_p4 }
 0x2e6   : > { %p1042_p9 = pnand %p1041_p8, %p1037_p6 }
 0x2e8   : > { %1045 = shalt.err (!%p1042_p9)
}
 0x2e9   : > { %846 = dma.vmem_to_hbm [thread:$0]  (%p1251_p7), %s1331_s7, 128, %s1329_s28, %s629_s24  }
 0x2ea PF: > { %s656_s27 = sand.u32 1, %s1084_s21   ;;  %p1402_p11 = scmp.ne.s32.totalorder %s1393_s8, 0 }
 0x2eb   : > { %p1403_p2 = scmp.ge.s32.totalorder %s1104_s26, 2  ;;  %s657_s3 = scalar_lea.sflag [#allocation4], %s656_s27 }
 0x2ed   : > { %p860_p13 = pnand %p1403_p2, %p1402_p11 }
 0x2ef   : > { %p861_p0 = pneg %p860_p13 }
 0x2f1   : > { %1079 = dma.done.wait (%p861_p0), %s657_s3, 128  }
 0x2f2   : > { %1081 = vsyncadd (%p861_p0), %s657_s3, 4294967168  ;;  %s23_s26 = sadd.s32 1, %s1104_s26   ;;  %s1404_s21 = smov %s1088_s22 }
 0x2f3   : > { %p20_p5 = scmp.ge.s32.totalorder %s23_s26, 4   ;;  %s1405_s22 = smov %s1092_s23 }
 0x2f4   : > { %s1406_s23 = smov %s1260_s17  ;;  %s1407_s24 = smov %s1100_s25 }
 0x2f5   : > { %s1408_s25 = smov %s1410_s10  ;;  %22 = sbr.rel (!%p20_p5) target bundleno = 10 (0xa), region = 100 }
 0x2fa   :  { %662 = vsyncpa [#allocation3], 1 }
 0x2fb   :  { %664 = vsyncpa [#allocation3 + $0x1], 1 }
 0x2fc   :  { %665 = vsyncpa [#allocation6], 1 }
 0x2fd   :  { %666 = vsyncpa [#allocation4], 1 }
 0x2fe   :  { %668 = vsyncpa [#allocation4 + $0x1], 1 }

</bundles_post_ra>
